<compile_context>
chip_gen: v7x
topology: tpu7x:2x2x1
jax: 0.10.0
libtpu: 0.0.40
codegen_flags: <defaults>
</compile_context>

<pallas_src>
import functools
import math

import jax
import jax.numpy as jnp
from jax.experimental import pallas as pl
from jax.experimental.pallas import tpu as pltpu

HIDDEN = 128


def _round_up(v, m):
    return (v + m - 1) // m * m


def _silu(z):
    # sigmoid(z) = 0.5 * (1 + tanh(0.5*z)): one EUP push per element
    # (vs. exp + reciprocal = two pushes).
    return z * (0.5 * (1.0 + jnp.tanh(0.5 * z)))


def model_kernel(xp_ref, r2_ref,
                 w0m_ref, w0s_ref, w0p_ref, b0_ref,
                 w1_ref, b1_ref, w2_ref, b2_ref,
                 w3_ref, b3_ref, w4_ref, b4_ref,
                 wo_ref, bo_ref,
                 out_ref, *, l, lt, t):
    bf16 = jnp.bfloat16

    xp = xp_ref[...]                       # (TB, L*T + P) f32, lane-dense slab
    x = xp[:, :lt]                         # (TB, L*T)
    p = xp[:, lt:]                         # (TB, P)

    # --- per-segment statistics: ONE fused MXU dot (K = 2*L*T) ---------------
    # [m | E[x^2]] = [x | x*x] @ blockdiag(R, R),  R = kron(I_L, ones(T,1)/T)
    st = jnp.dot(jnp.concatenate([x, x * x], axis=-1), r2_ref[...],
                 preferred_element_type=jnp.float32)       # (TB, 2L)
    m = st[:, :l]
    ex2 = st[:, l:]
    var = (ex2 - m * m) * (t / (t - 1.0))  # unbiased (ddof=1); requires T > 1
    s = jnp.sqrt(jnp.maximum(var, 0.0))

    # --- first Linear(2L+P -> 128) + SiLU: split-slab bf16 dots (no concat) --
    z0 = (jnp.dot(m.astype(bf16), w0m_ref[...], preferred_element_type=jnp.float32)
          + jnp.dot(s.astype(bf16), w0s_ref[...], preferred_element_type=jnp.float32)
          + jnp.dot(p.astype(bf16), w0p_ref[...], preferred_element_type=jnp.float32)
          + b0_ref[...])
    h = _silu(z0)

    # --- 4 x SkipBlock: SiLU(Linear(h)) + h  (Dropout(0.2) = eval identity) --
    for w_ref, b_ref in ((w1_ref, b1_ref), (w2_ref, b2_ref),
                         (w3_ref, b3_ref), (w4_ref, b4_ref)):
        z = jnp.dot(h.astype(bf16), w_ref[...],
                    preferred_element_type=jnp.float32) + b_ref[...]
        h = _silu(z) + h

    # --- final Linear(128 -> out_pad): lane-dense bf16 writeback --------------
    y = jnp.dot(h.astype(bf16), wo_ref[...],
                preferred_element_type=jnp.float32) + bo_ref[...]
    out_ref[...] = y.astype(out_ref.dtype)


def make_params(key, number_of_predictors, lead_time, degree=12, hidden=HIDDEN):
    """Synthetic init mimicking nn.Linear default U[-1/sqrt(fan_in), 1/sqrt(fan_in))."""
    in_dim = number_of_predictors + 2 * lead_time
    out_dim = (degree + 1) * lead_time
    out_pad = _round_up(out_dim, 128)
    L = lead_time

    def linear(k, fan_in, fan_out):
        k1, k2 = jax.random.split(k)
        bound = 1.0 / math.sqrt(fan_in)
        w = jax.random.uniform(k1, (fan_in, fan_out), jnp.float32, -bound, bound)
        b = jax.random.uniform(k2, (1, fan_out), jnp.float32, -bound, bound)
        return w, b

    keys = jax.random.split(key, 6)
    w0, b0 = linear(keys[0], in_dim, hidden)
    w1, b1 = linear(keys[1], hidden, hidden)
    w2, b2 = linear(keys[2], hidden, hidden)
    w3, b3 = linear(keys[3], hidden, hidden)
    w4, b4 = linear(keys[4], hidden, hidden)
    wo, bo = linear(keys[5], hidden, out_dim)

    # PyTorch feeds the first Linear with interleaved [m0, s0, m1, s1, ..., p].
    # Split its weight rows into mean / std / p slabs (mathematically identical)
    # so the kernel issues three bf16 dots on naturally-laid-out operands.
    bf16 = jnp.bfloat16
    w0m = w0[0:2 * L:2].astype(bf16)       # (L, hidden)
    w0s = w0[1:2 * L:2].astype(bf16)       # (L, hidden)
    w0p = w0[2 * L:].astype(bf16)          # (P, hidden)

    # zero-pad the output projection to a lane-dense (multiple of 128) width
    wo_p = jnp.zeros((hidden, out_pad), jnp.float32).at[:, :out_dim].set(wo)
    bo_p = jnp.zeros((1, out_pad), jnp.float32).at[:, :out_dim].set(bo)

    return dict(
        # kernel-side parameters
        w0m=w0m, w0s=w0s, w0p=w0p, b0=b0,
        w1=w1.astype(bf16), b1=b1,
        w2=w2.astype(bf16), b2=b2,
        w3=w3.astype(bf16), b3=b3,
        w4=w4.astype(bf16), b4=b4,
        wo=wo_p.astype(bf16), bo=bo_p,
        # reference-side originals (f32, unpadded, interleaved first layer)
        w0_full=w0, wo_full=wo, bo_full=bo)


@functools.partial(jax.jit, static_argnames=("lead_time", "degree"))
def model_forward(x, p, params, lead_time, degree=12):
    B, L, T = x.shape
    P = p.shape[1]
    lt = L * T
    out_dim = (degree + 1) * lead_time
    out_pad = params["wo"].shape[1]

    # Batch tiling: large tiles to amortize per-step overhead, minimal batch
    # padding (TB derived from #tiles), and >= 2 grid steps for large B so the
    # parallel grid axis can be sharded over v7x's two TensorCores.
    TB_MAX = 2048
    ntiles = max(1, -(-B // TB_MAX))
    if ntiles == 1 and B >= 512:
        ntiles = 2
    TB = _round_up(-(-B // ntiles), 8)
    Bp = ntiles * TB

    # One lane-dense pipelined activation slab: [flatten(x) | p]
    xp = jnp.concatenate([x.reshape(B, lt), p], axis=-1)
    if Bp != B:
        xp = jnp.pad(xp, ((0, Bp - B), (0, 0)))

    # blockdiag(R, R) with R = kron(I_L, ones(T,1)/T): shape (2*L*T, 2*L).
    # Static; constant-folded by XLA.
    r2 = jnp.kron(jnp.eye(2 * L, dtype=jnp.float32),
                  jnp.full((T, 1), 1.0 / T, dtype=jnp.float32))

    def resident(shape):
        return pl.BlockSpec(shape, lambda i: (0, 0))

    in_specs = [
        pl.BlockSpec((TB, lt + P), lambda i: (i, 0)),          # xp (pipelined)
        resident((2 * lt, 2 * L)),                             # R2
        resident((L, HIDDEN)), resident((L, HIDDEN)),          # w0m, w0s
        resident((P, HIDDEN)), resident((1, HIDDEN)),          # w0p, b0
        resident((HIDDEN, HIDDEN)), resident((1, HIDDEN)),     # w1, b1
        resident((HIDDEN, HIDDEN)), resident((1, HIDDEN)),     # w2, b2
        resident((HIDDEN, HIDDEN)), resident((1, HIDDEN)),     # w3, b3
        resident((HIDDEN, HIDDEN)), resident((1, HIDDEN)),     # w4, b4
        resident((HIDDEN, out_pad)), resident((1, out_pad)),   # wo, bo
    ]

    y = pl.pallas_call(
        functools.partial(model_kernel, l=L, lt=lt, t=float(T)),
        out_shape=jax.ShapeDtypeStruct((Bp, out_pad), jnp.bfloat16),
        grid=(ntiles,),
        in_specs=in_specs,
        out_specs=pl.BlockSpec((TB, out_pad), lambda i: (i, 0)),
        compiler_params=pltpu.CompilerParams(
            dimension_semantics=("parallel",),
            vmem_limit_bytes=48 * 1024 * 1024),
    )(xp, r2,
      params["w0m"], params["w0s"], params["w0p"], params["b0"],
      params["w1"], params["b1"], params["w2"], params["b2"],
      params["w3"], params["b3"], params["w4"], params["b4"],
      params["wo"], params["bo"])

    # drop batch padding and zero-padded output lanes, upcast, then
    # Y.view((B * lead_time, 1, degree + 1))
    y = y[:B, :out_dim].astype(jnp.float32)
    return y.reshape(B * lead_time, 1, degree + 1)


def reference_forward(x, p, params, lead_time, degree=12):
    """Plain-JAX mirror of the PyTorch forward (eval mode).

    Uses the ORIGINAL interleaved first-layer weight (validates the kernel's
    weight splitting) and the two-pass std.  Matmuls use bf16 operands with
    f32 accumulation to match the kernel's precision strategy.
    """
    B, L, T = x.shape
    bf16 = jnp.bfloat16
    m = jnp.mean(x, axis=-1, keepdims=True)
    s = jnp.std(x, axis=-1, ddof=1, keepdims=True)
    feat = jnp.concatenate([m, s], axis=-1).reshape(B, 2 * L)   # [m0,s0,m1,s1,...]
    feat = jnp.concatenate([feat, p], axis=-1)

    def silu(z):
        return z * jax.nn.sigmoid(z)

    h = silu(jnp.dot(feat.astype(bf16), params["w0_full"].astype(bf16),
                     preferred_element_type=jnp.float32) + params["b0"])
    for i in (1, 2, 3, 4):
        z = jnp.dot(h.astype(bf16), params[f"w{i}"],
                    preferred_element_type=jnp.float32) + params[f"b{i}"]
        h = silu(z) + h
    y = jnp.dot(h.astype(bf16), params["wo_full"].astype(bf16),
                preferred_element_type=jnp.float32) + params["bo_full"]
    return y.reshape(B * lead_time, 1, degree + 1)


if __name__ == "__main__":
    # small shapes consistent with the module
    B = 2
    lead_time = 8
    number_of_predictors = 4
    T = 16                     # trailing axis reduced by mean/std (must be > 1)
    degree = 12

    key = jax.random.PRNGKey(0)
    kx, kp, kw = jax.random.split(key, 3)
    x = jax.random.normal(kx, (B, lead_time, T), jnp.float32)
    p = jax.random.normal(kp, (B, number_of_predictors), jnp.float32)
    params = make_params(kw, number_of_predictors, lead_time, degree)

    out = model_forward(x, p, params, lead_time, degree)
    out = jax.block_until_ready(out)

    ref = reference_forward(x, p, params, lead_time, degree)
    assert out.shape == (B * lead_time, 1, degree + 1), out.shape
    err = float(jnp.max(jnp.abs(out - ref)))
    # bf16 matmuls + bf16 writeback + one-pass variance => relaxed tolerance
    assert jnp.allclose(out, ref, atol=2e-2, rtol=2e-2), err

    print("KERNEL_OK")
</pallas_src>

<mosaic_0001>
module attributes {stable_mosaic.version = 11 : i64} {
  func.func @model_kernel(%arg0: i32, %arg1: memref<8x132xf32, #tpu.memory_space<vmem>>, %arg2: memref<256x16xf32, #tpu.memory_space<vmem>>, %arg3: memref<8x128xbf16, #tpu.memory_space<vmem>>, %arg4: memref<8x128xbf16, #tpu.memory_space<vmem>>, %arg5: memref<4x128xbf16, #tpu.memory_space<vmem>>, %arg6: memref<1x128xf32, #tpu.memory_space<vmem>>, %arg7: memref<128x128xbf16, #tpu.memory_space<vmem>>, %arg8: memref<1x128xf32, #tpu.memory_space<vmem>>, %arg9: memref<128x128xbf16, #tpu.memory_space<vmem>>, %arg10: memref<1x128xf32, #tpu.memory_space<vmem>>, %arg11: memref<128x128xbf16, #tpu.memory_space<vmem>>, %arg12: memref<1x128xf32, #tpu.memory_space<vmem>>, %arg13: memref<128x128xbf16, #tpu.memory_space<vmem>>, %arg14: memref<1x128xf32, #tpu.memory_space<vmem>>, %arg15: memref<128x128xbf16, #tpu.memory_space<vmem>>, %arg16: memref<1x128xf32, #tpu.memory_space<vmem>>, %arg17: memref<8x128xbf16, #tpu.memory_space<vmem>>) attributes {dimension_semantics = [#tpu.dimension_semantics<parallel>], iteration_bounds = array<i64: 1>, scalar_prefetch = 0 : i64, scratch_operands = 0 : i64, tpu.core_type = #tpu.core_type<tc>, window_params = [{transform_indices = @transform_0, window_bounds = array<i64: 8, 132>}, {pipeline_mode = #tpu.pipeline_mode<synchronous>, transform_indices = @transform_1, window_bounds = array<i64: 256, 16>}, {pipeline_mode = #tpu.pipeline_mode<synchronous>, transform_indices = @transform_2, window_bounds = array<i64: 8, 128>}, {pipeline_mode = #tpu.pipeline_mode<synchronous>, transform_indices = @transform_3, window_bounds = array<i64: 8, 128>}, {pipeline_mode = #tpu.pipeline_mode<synchronous>, transform_indices = @transform_4, window_bounds = array<i64: 4, 128>}, {pipeline_mode = #tpu.pipeline_mode<synchronous>, transform_indices = @transform_5, window_bounds = array<i64: 1, 128>}, {pipeline_mode = #tpu.pipeline_mode<synchronous>, transform_indices = @transform_6, window_bounds = array<i64: 128, 128>}, {pipeline_mode = #tpu.pipeline_mode<synchronous>, transform_indices = @transform_7, window_bounds = array<i64: 1, 128>}, {pipeline_mode = #tpu.pipeline_mode<synchronous>, transform_indices = @transform_8, window_bounds = array<i64: 128, 128>}, {pipeline_mode = #tpu.pipeline_mode<synchronous>, transform_indices = @transform_9, window_bounds = array<i64: 1, 128>}, {pipeline_mode = #tpu.pipeline_mode<synchronous>, transform_indices = @transform_10, window_bounds = array<i64: 128, 128>}, {pipeline_mode = #tpu.pipeline_mode<synchronous>, transform_indices = @transform_11, window_bounds = array<i64: 1, 128>}, {pipeline_mode = #tpu.pipeline_mode<synchronous>, transform_indices = @transform_12, window_bounds = array<i64: 128, 128>}, {pipeline_mode = #tpu.pipeline_mode<synchronous>, transform_indices = @transform_13, window_bounds = array<i64: 1, 128>}, {pipeline_mode = #tpu.pipeline_mode<synchronous>, transform_indices = @transform_14, window_bounds = array<i64: 128, 128>}, {pipeline_mode = #tpu.pipeline_mode<synchronous>, transform_indices = @transform_15, window_bounds = array<i64: 1, 128>}, {transform_indices = @transform_16, window_bounds = array<i64: 8, 128>}]} {
    %c0 = arith.constant 0 : index
    %c0_0 = arith.constant 0 : index
    %0 = vector.load %arg1[%c0, %c0_0] : memref<8x132xf32, #tpu.memory_space<vmem>>, vector<8x132xf32>
    %1 = vector.extract_strided_slice %0 {offsets = [0, 0], sizes = [8, 128], strides = [1, 1]} : vector<8x132xf32> to vector<8x128xf32>
    %2 = vector.extract_strided_slice %0 {offsets = [0, 128], sizes = [8, 4], strides = [1, 1]} : vector<8x132xf32> to vector<8x4xf32>
    %3 = arith.mulf %1, %1 : vector<8x128xf32>
    %4 = tpu.concatenate %1, %3 in 1 : vector<8x128xf32>, vector<8x128xf32> -> vector<8x256xf32>
    %c0_1 = arith.constant 0 : index
    %c0_2 = arith.constant 0 : index
    %5 = vector.load %arg2[%c0_1, %c0_2] : memref<256x16xf32, #tpu.memory_space<vmem>>, vector<256x16xf32>
    %cst = arith.constant dense<0.000000e+00> : vector<8x16xf32>
    %6 = tpu.matmul %4, %5, %cst {dimension_numbers = #tpu.dot_dimension_numbers<[1], [0], [0], [1], [0, 0, 1, 1], [], []>} : vector<8x256xf32>, vector<256x16xf32>, vector<8x16xf32> -> vector<8x16xf32>
    %7 = vector.extract_strided_slice %6 {offsets = [0, 0], sizes = [8, 8], strides = [1, 1]} : vector<8x16xf32> to vector<8x8xf32>
    %8 = vector.extract_strided_slice %6 {offsets = [0, 8], sizes = [8, 8], strides = [1, 1]} : vector<8x16xf32> to vector<8x8xf32>
    %9 = arith.mulf %7, %7 : vector<8x8xf32>
    %10 = arith.subf %8, %9 : vector<8x8xf32>
    %cst_3 = arith.constant 1.06666672 : f32
    %11 = vector.broadcast %cst_3 : f32 to vector<8x8xf32>
    %12 = arith.mulf %10, %11 : vector<8x8xf32>
    %cst_4 = arith.constant 0.000000e+00 : f32
    %13 = vector.broadcast %cst_4 : f32 to vector<8x8xf32>
    %14 = arith.maximumf %12, %13 : vector<8x8xf32>
    %15 = math.sqrt %14 : vector<8x8xf32>
    %16 = arith.truncf %7 : vector<8x8xf32> to vector<8x8xbf16>
    %c0_5 = arith.constant 0 : index
    %c0_6 = arith.constant 0 : index
    %17 = vector.load %arg3[%c0_5, %c0_6] : memref<8x128xbf16, #tpu.memory_space<vmem>>, vector<8x128xbf16>
    %cst_7 = arith.constant dense<0.000000e+00> : vector<8x128xf32>
    %18 = tpu.matmul %16, %17, %cst_7 {dimension_numbers = #tpu.dot_dimension_numbers<[1], [0], [0], [1], [0, 0, 1, 1], [], []>} : vector<8x8xbf16>, vector<8x128xbf16>, vector<8x128xf32> -> vector<8x128xf32>
    %19 = arith.truncf %15 : vector<8x8xf32> to vector<8x8xbf16>
    %c0_8 = arith.constant 0 : index
    %c0_9 = arith.constant 0 : index
    %20 = vector.load %arg4[%c0_8, %c0_9] : memref<8x128xbf16, #tpu.memory_space<vmem>>, vector<8x128xbf16>
    %cst_10 = arith.constant dense<0.000000e+00> : vector<8x128xf32>
    %21 = tpu.matmul %19, %20, %cst_10 {dimension_numbers = #tpu.dot_dimension_numbers<[1], [0], [0], [1], [0, 0, 1, 1], [], []>} : vector<8x8xbf16>, vector<8x128xbf16>, vector<8x128xf32> -> vector<8x128xf32>
    %22 = arith.addf %18, %21 : vector<8x128xf32>
    %23 = arith.truncf %2 : vector<8x4xf32> to vector<8x4xbf16>
    %c0_11 = arith.constant 0 : index
    %c0_12 = arith.constant 0 : index
    %24 = vector.load %arg5[%c0_11, %c0_12] : memref<4x128xbf16, #tpu.memory_space<vmem>>, vector<4x128xbf16>
    %cst_13 = arith.constant dense<0.000000e+00> : vector<8x128xf32>
    %25 = tpu.matmul %23, %24, %cst_13 {dimension_numbers = #tpu.dot_dimension_numbers<[1], [0], [0], [1], [0, 0, 1, 1], [], []>} : vector<8x4xbf16>, vector<4x128xbf16>, vector<8x128xf32> -> vector<8x128xf32>
    %26 = arith.addf %22, %25 : vector<8x128xf32>
    %c0_14 = arith.constant 0 : index
    %c0_15 = arith.constant 0 : index
    %27 = vector.load %arg6[%c0_14, %c0_15] : memref<1x128xf32, #tpu.memory_space<vmem>>, vector<1x128xf32>
    %28 = vector.broadcast %27 : vector<1x128xf32> to vector<8x128xf32>
    %29 = arith.addf %26, %28 : vector<8x128xf32>
    %cst_16 = arith.constant 5.000000e-01 : f32
    %30 = vector.broadcast %cst_16 : f32 to vector<8x128xf32>
    %31 = arith.mulf %30, %29 : vector<8x128xf32>
    %32 = math.tanh %31 : vector<8x128xf32>
    %cst_17 = arith.constant 1.000000e+00 : f32
    %33 = vector.broadcast %cst_17 : f32 to vector<8x128xf32>
    %34 = arith.addf %33, %32 : vector<8x128xf32>
    %cst_18 = arith.constant 5.000000e-01 : f32
    %35 = vector.broadcast %cst_18 : f32 to vector<8x128xf32>
    %36 = arith.mulf %35, %34 : vector<8x128xf32>
    %37 = arith.mulf %29, %36 : vector<8x128xf32>
    %38 = arith.truncf %37 : vector<8x128xf32> to vector<8x128xbf16>
    %c0_19 = arith.constant 0 : index
    %c0_20 = arith.constant 0 : index
    %39 = vector.load %arg7[%c0_19, %c0_20] : memref<128x128xbf16, #tpu.memory_space<vmem>>, vector<128x128xbf16>
    %cst_21 = arith.constant dense<0.000000e+00> : vector<8x128xf32>
    %40 = tpu.matmul %38, %39, %cst_21 {dimension_numbers = #tpu.dot_dimension_numbers<[1], [0], [0], [1], [0, 0, 1, 1], [], []>} : vector<8x128xbf16>, vector<128x128xbf16>, vector<8x128xf32> -> vector<8x128xf32>
    %c0_22 = arith.constant 0 : index
    %c0_23 = arith.constant 0 : index
    %41 = vector.load %arg8[%c0_22, %c0_23] : memref<1x128xf32, #tpu.memory_space<vmem>>, vector<1x128xf32>
    %42 = vector.broadcast %41 : vector<1x128xf32> to vector<8x128xf32>
    %43 = arith.addf %40, %42 : vector<8x128xf32>
    %cst_24 = arith.constant 5.000000e-01 : f32
    %44 = vector.broadcast %cst_24 : f32 to vector<8x128xf32>
    %45 = arith.mulf %44, %43 : vector<8x128xf32>
    %46 = math.tanh %45 : vector<8x128xf32>
    %cst_25 = arith.constant 1.000000e+00 : f32
    %47 = vector.broadcast %cst_25 : f32 to vector<8x128xf32>
    %48 = arith.addf %47, %46 : vector<8x128xf32>
    %cst_26 = arith.constant 5.000000e-01 : f32
    %49 = vector.broadcast %cst_26 : f32 to vector<8x128xf32>
    %50 = arith.mulf %49, %48 : vector<8x128xf32>
    %51 = arith.mulf %43, %50 : vector<8x128xf32>
    %52 = arith.addf %51, %37 : vector<8x128xf32>
    %53 = arith.truncf %52 : vector<8x128xf32> to vector<8x128xbf16>
    %c0_27 = arith.constant 0 : index
    %c0_28 = arith.constant 0 : index
    %54 = vector.load %arg9[%c0_27, %c0_28] : memref<128x128xbf16, #tpu.memory_space<vmem>>, vector<128x128xbf16>
    %cst_29 = arith.constant dense<0.000000e+00> : vector<8x128xf32>
    %55 = tpu.matmul %53, %54, %cst_29 {dimension_numbers = #tpu.dot_dimension_numbers<[1], [0], [0], [1], [0, 0, 1, 1], [], []>} : vector<8x128xbf16>, vector<128x128xbf16>, vector<8x128xf32> -> vector<8x128xf32>
    %c0_30 = arith.constant 0 : index
    %c0_31 = arith.constant 0 : index
    %56 = vector.load %arg10[%c0_30, %c0_31] : memref<1x128xf32, #tpu.memory_space<vmem>>, vector<1x128xf32>
    %57 = vector.broadcast %56 : vector<1x128xf32> to vector<8x128xf32>
    %58 = arith.addf %55, %57 : vector<8x128xf32>
    %cst_32 = arith.constant 5.000000e-01 : f32
    %59 = vector.broadcast %cst_32 : f32 to vector<8x128xf32>
    %60 = arith.mulf %59, %58 : vector<8x128xf32>
    %61 = math.tanh %60 : vector<8x128xf32>
    %cst_33 = arith.constant 1.000000e+00 : f32
    %62 = vector.broadcast %cst_33 : f32 to vector<8x128xf32>
    %63 = arith.addf %62, %61 : vector<8x128xf32>
    %cst_34 = arith.constant 5.000000e-01 : f32
    %64 = vector.broadcast %cst_34 : f32 to vector<8x128xf32>
    %65 = arith.mulf %64, %63 : vector<8x128xf32>
    %66 = arith.mulf %58, %65 : vector<8x128xf32>
    %67 = arith.addf %66, %52 : vector<8x128xf32>
    %68 = arith.truncf %67 : vector<8x128xf32> to vector<8x128xbf16>
    %c0_35 = arith.constant 0 : index
    %c0_36 = arith.constant 0 : index
    %69 = vector.load %arg11[%c0_35, %c0_36] : memref<128x128xbf16, #tpu.memory_space<vmem>>, vector<128x128xbf16>
    %cst_37 = arith.constant dense<0.000000e+00> : vector<8x128xf32>
    %70 = tpu.matmul %68, %69, %cst_37 {dimension_numbers = #tpu.dot_dimension_numbers<[1], [0], [0], [1], [0, 0, 1, 1], [], []>} : vector<8x128xbf16>, vector<128x128xbf16>, vector<8x128xf32> -> vector<8x128xf32>
    %c0_38 = arith.constant 0 : index
    %c0_39 = arith.constant 0 : index
    %71 = vector.load %arg12[%c0_38, %c0_39] : memref<1x128xf32, #tpu.memory_space<vmem>>, vector<1x128xf32>
    %72 = vector.broadcast %71 : vector<1x128xf32> to vector<8x128xf32>
    %73 = arith.addf %70, %72 : vector<8x128xf32>
    %cst_40 = arith.constant 5.000000e-01 : f32
    %74 = vector.broadcast %cst_40 : f32 to vector<8x128xf32>
    %75 = arith.mulf %74, %73 : vector<8x128xf32>
    %76 = math.tanh %75 : vector<8x128xf32>
    %cst_41 = arith.constant 1.000000e+00 : f32
    %77 = vector.broadcast %cst_41 : f32 to vector<8x128xf32>
    %78 = arith.addf %77, %76 : vector<8x128xf32>
    %cst_42 = arith.constant 5.000000e-01 : f32
    %79 = vector.broadcast %cst_42 : f32 to vector<8x128xf32>
    %80 = arith.mulf %79, %78 : vector<8x128xf32>
    %81 = arith.mulf %73, %80 : vector<8x128xf32>
    %82 = arith.addf %81, %67 : vector<8x128xf32>
    %83 = arith.truncf %82 : vector<8x128xf32> to vector<8x128xbf16>
    %c0_43 = arith.constant 0 : index
    %c0_44 = arith.constant 0 : index
    %84 = vector.load %arg13[%c0_43, %c0_44] : memref<128x128xbf16, #tpu.memory_space<vmem>>, vector<128x128xbf16>
    %cst_45 = arith.constant dense<0.000000e+00> : vector<8x128xf32>
    %85 = tpu.matmul %83, %84, %cst_45 {dimension_numbers = #tpu.dot_dimension_numbers<[1], [0], [0], [1], [0, 0, 1, 1], [], []>} : vector<8x128xbf16>, vector<128x128xbf16>, vector<8x128xf32> -> vector<8x128xf32>
    %c0_46 = arith.constant 0 : index
    %c0_47 = arith.constant 0 : index
    %86 = vector.load %arg14[%c0_46, %c0_47] : memref<1x128xf32, #tpu.memory_space<vmem>>, vector<1x128xf32>
    %87 = vector.broadcast %86 : vector<1x128xf32> to vector<8x128xf32>
    %88 = arith.addf %85, %87 : vector<8x128xf32>
    %cst_48 = arith.constant 5.000000e-01 : f32
    %89 = vector.broadcast %cst_48 : f32 to vector<8x128xf32>
    %90 = arith.mulf %89, %88 : vector<8x128xf32>
    %91 = math.tanh %90 : vector<8x128xf32>
    %cst_49 = arith.constant 1.000000e+00 : f32
    %92 = vector.broadcast %cst_49 : f32 to vector<8x128xf32>
    %93 = arith.addf %92, %91 : vector<8x128xf32>
    %cst_50 = arith.constant 5.000000e-01 : f32
    %94 = vector.broadcast %cst_50 : f32 to vector<8x128xf32>
    %95 = arith.mulf %94, %93 : vector<8x128xf32>
    %96 = arith.mulf %88, %95 : vector<8x128xf32>
    %97 = arith.addf %96, %82 : vector<8x128xf32>
    %98 = arith.truncf %97 : vector<8x128xf32> to vector<8x128xbf16>
    %c0_51 = arith.constant 0 : index
    %c0_52 = arith.constant 0 : index
    %99 = vector.load %arg15[%c0_51, %c0_52] : memref<128x128xbf16, #tpu.memory_space<vmem>>, vector<128x128xbf16>
    %cst_53 = arith.constant dense<0.000000e+00> : vector<8x128xf32>
    %100 = tpu.matmul %98, %99, %cst_53 {dimension_numbers = #tpu.dot_dimension_numbers<[1], [0], [0], [1], [0, 0, 1, 1], [], []>} : vector<8x128xbf16>, vector<128x128xbf16>, vector<8x128xf32> -> vector<8x128xf32>
    %c0_54 = arith.constant 0 : index
    %c0_55 = arith.constant 0 : index
    %101 = vector.load %arg16[%c0_54, %c0_55] : memref<1x128xf32, #tpu.memory_space<vmem>>, vector<1x128xf32>
    %102 = vector.broadcast %101 : vector<1x128xf32> to vector<8x128xf32>
    %103 = arith.addf %100, %102 : vector<8x128xf32>
    %104 = arith.truncf %103 : vector<8x128xf32> to vector<8x128xbf16>
    %c0_56 = arith.constant 0 : index
    %c0_57 = arith.constant 0 : index
    %105 = vector.load %arg17[%c0_56, %c0_57] : memref<8x128xbf16, #tpu.memory_space<vmem>>, vector<8x128xbf16>
    tpu.vector_store %arg17[%c0_56, %c0_57], %104 {strides = array<i32>} : memref<8x128xbf16, #tpu.memory_space<vmem>>, vector<8x128xbf16>,
    return
  }
  func.func @transform_0(%arg0: i32) -> (i32, i32) {
    %c0_i32 = arith.constant 0 : i32
    %c0_i32_0 = arith.constant 0 : i32
    return %arg0, %c0_i32 : i32, i32
  }
  func.func @transform_1(%arg0: i32) -> (i32, i32) {
    %c0_i32 = arith.constant 0 : i32
    %c0_i32_0 = arith.constant 0 : i32
    %c0_i32_1 = arith.constant 0 : i32
    return %c0_i32, %c0_i32_0 : i32, i32
  }
  func.func @transform_2(%arg0: i32) -> (i32, i32) {
    %c0_i32 = arith.constant 0 : i32
    %c0_i32_0 = arith.constant 0 : i32
    %c0_i32_1 = arith.constant 0 : i32
    return %c0_i32, %c0_i32_0 : i32, i32
  }
  func.func @transform_3(%arg0: i32) -> (i32, i32) {
    %c0_i32 = arith.constant 0 : i32
    %c0_i32_0 = arith.constant 0 : i32
    %c0_i32_1 = arith.constant 0 : i32
    return %c0_i32, %c0_i32_0 : i32, i32
  }
  func.func @transform_4(%arg0: i32) -> (i32, i32) {
    %c0_i32 = arith.constant 0 : i32
    %c0_i32_0 = arith.constant 0 : i32
    %c0_i32_1 = arith.constant 0 : i32
    return %c0_i32, %c0_i32_0 : i32, i32
  }
  func.func @transform_5(%arg0: i32) -> (i32, i32) {
    %c0_i32 = arith.constant 0 : i32
    %c0_i32_0 = arith.constant 0 : i32
    %c0_i32_1 = arith.constant 0 : i32
    return %c0_i32, %c0_i32_0 : i32, i32
  }
  func.func @transform_6(%arg0: i32) -> (i32, i32) {
    %c0_i32 = arith.constant 0 : i32
    %c0_i32_0 = arith.constant 0 : i32
    %c0_i32_1 = arith.constant 0 : i32
    return %c0_i32, %c0_i32_0 : i32, i32
  }
  func.func @transform_7(%arg0: i32) -> (i32, i32) {
    %c0_i32 = arith.constant 0 : i32
    %c0_i32_0 = arith.constant 0 : i32
    %c0_i32_1 = arith.constant 0 : i32
    return %c0_i32, %c0_i32_0 : i32, i32
  }
  func.func @transform_8(%arg0: i32) -> (i32, i32) {
    %c0_i32 = arith.constant 0 : i32
    %c0_i32_0 = arith.constant 0 : i32
    %c0_i32_1 = arith.constant 0 : i32
    return %c0_i32, %c0_i32_0 : i32, i32
  }
  func.func @transform_9(%arg0: i32) -> (i32, i32) {
    %c0_i32 = arith.constant 0 : i32
    %c0_i32_0 = arith.constant 0 : i32
    %c0_i32_1 = arith.constant 0 : i32
    return %c0_i32, %c0_i32_0 : i32, i32
  }
  func.func @transform_10(%arg0: i32) -> (i32, i32) {
    %c0_i32 = arith.constant 0 : i32
    %c0_i32_0 = arith.constant 0 : i32
    %c0_i32_1 = arith.constant 0 : i32
    return %c0_i32, %c0_i32_0 : i32, i32
  }
  func.func @transform_11(%arg0: i32) -> (i32, i32) {
    %c0_i32 = arith.constant 0 : i32
    %c0_i32_0 = arith.constant 0 : i32
    %c0_i32_1 = arith.constant 0 : i32
    return %c0_i32, %c0_i32_0 : i32, i32
  }
  func.func @transform_12(%arg0: i32) -> (i32, i32) {
    %c0_i32 = arith.constant 0 : i32
    %c0_i32_0 = arith.constant 0 : i32
    %c0_i32_1 = arith.constant 0 : i32
    return %c0_i32, %c0_i32_0 : i32, i32
  }
  func.func @transform_13(%arg0: i32) -> (i32, i32) {
    %c0_i32 = arith.constant 0 : i32
    %c0_i32_0 = arith.constant 0 : i32
    %c0_i32_1 = arith.constant 0 : i32
    return %c0_i32, %c0_i32_0 : i32, i32
  }
  func.func @transform_14(%arg0: i32) -> (i32, i32) {
    %c0_i32 = arith.constant 0 : i32
    %c0_i32_0 = arith.constant 0 : i32
    %c0_i32_1 = arith.constant 0 : i32
    return %c0_i32, %c0_i32_0 : i32, i32
  }
  func.func @transform_15(%arg0: i32) -> (i32, i32) {
    %c0_i32 = arith.constant 0 : i32
    %c0_i32_0 = arith.constant 0 : i32
    %c0_i32_1 = arith.constant 0 : i32
    return %c0_i32, %c0_i32_0 : i32, i32
  }
  func.func @transform_16(%arg0: i32) -> (i32, i32) {
    %c0_i32 = arith.constant 0 : i32
    %c0_i32_0 = arith.constant 0 : i32
    return %arg0, %c0_i32 : i32, i32
  }
}

</mosaic_0001>

<bundles_post_ra>
// kernel: model_forward.1
= control target key start
LH: loop header
LB: loop body
LE: loop exit
PB: predicated region body
PF: predicated region fallthrough
CT: control target
= control target key end

     0   :  { %vm185_vm0 = vcmask 1043456   ;;  %v1270_v51 = vmov 0.0   ;;  %vm1271_vm1 = vmmov 0   ;;  %vm181_vm2 = vcmask 64512   ;;  %s1672_s1 = inlined_call_operand.vmem [shape: f32[256,16], index: 1, kind: input, shape index: {}]   ;;  %s1673_s0 = inlined_call_operand.vmem [shape: f32[8,132], index: 0, kind: input, shape index: {}]   ;;  %s1674_s2 = inlined_call_operand.vmem [shape: bf16[8,128], index: 2, kind: input, shape index: {}]   ;;  %s1675_s3 = inlined_call_operand.vmem [shape: bf16[8,128], index: 3, kind: input, shape index: {}]   ;;  %s1676_s4 = inlined_call_operand.vmem [shape: bf16[4,128], index: 4, kind: input, shape index: {}]   ;;  %s1677_s6 = inlined_call_operand.vmem [shape: bf16[128,128], index: 6, kind: input, shape index: {}]   ;;  %s1678_s8 = inlined_call_operand.vmem [shape: bf16[128,128], index: 8, kind: input, shape index: {}]   ;;  %s1679_s5 = inlined_call_operand.vmem [shape: f32[1,128], index: 5, kind: input, shape index: {}]   ;;  %s1680_s10 = inlined_call_operand.vmem [shape: bf16[128,128], index: 10, kind: input, shape index: {}]   ;;  %s1681_s7 = inlined_call_operand.vmem [shape: f32[1,128], index: 7, kind: input, shape index: {}]   ;;  %s1682_s12 = inlined_call_operand.vmem [shape: bf16[128,128], index: 12, kind: input, shape index: {}]   ;;  %s1683_s9 = inlined_call_operand.vmem [shape: f32[1,128], index: 9, kind: input, shape index: {}]   ;;  %s1684_s14 = inlined_call_operand.vmem [shape: bf16[128,128], index: 14, kind: input, shape index: {}]   ;;  %s1685_s11 = inlined_call_operand.vmem [shape: f32[1,128], index: 11, kind: input, shape index: {}]   ;;  %s1686_s13 = inlined_call_operand.vmem [shape: f32[1,128], index: 13, kind: input, shape index: {}]   ;;  %s1687_s15 = inlined_call_operand.vmem [shape: f32[1,128], index: 15, kind: input, shape index: {}]   ;;  %s1688_s16 = inlined_call_operand.vmem [shape: bf16[8,128], index: 16, kind: output, shape index: {}]  }
   0x1   :  { %1690 = sst [smem:[#allocation2_spill]] %s1672_s1  ;;  %v54_v25 = vld [vmem:[%s1673_s0] sm:$0xff]  ;;  %1070 = vmatprep.subr.bf16.mxu1 %v1270_v51  ;;  %1072 = vmatprep.mubr.msk.bf16.mxu1 %vm1271_vm1, %v1270_v51  ;;  %v55_v60 = vld [vmem:[%s1673_s0 + $0x8] sm:$0xff]  ;;  %vm281_vm3 = vcmask 1041408   ;;  %vm277_vm4 = vcmask 31744  }
   0x2   :  { %s1691_s23 = sld [smem:[#allocation2_spill]]  ;;  %v56_v26 = vmul.f32 %v54_v25, %v54_v25  ;;  %v175_v50 = vld [vmem:[%s1674_s2] sm:$0xf]  ;;  %s1272_s2 = smov 8   ;;  %v275_v62 = vpack.c.bf16 %v55_v60, %v55_v60 }
   0x3   :  { %v233_v52 = vsel %vm185_vm0, %v175_v50, 0  ;;  %v177_v53 = vld [vmem:[%s1675_s3] sm:$0xf]  ;;  %v1235_v50 = vld [vmem:[%s1680_s10 + $0x8] sm:$0xff]  }
   0x4   :  { %153 = vmatprep.mubr.f32.mxu0 %v56_v26  ;;  %1071 = vmatpush3.bf16.msra.mxu1 %v233_v52  ;;  %v187_v54 = vsel %vm185_vm0, %v177_v53, 0  ;;  %v276_v61 = vld [vmem:[%s1676_s4] sm:$0x3]  ;;  %s1273_s4 = smov 120   ;;  %v1225_v26 = vld [vmem:[%s1677_s6 + $0x38] sm:$0xff]  }
   0x5   :  { %1076 = vmatprep.subr.bf16.mxu1 %v1270_v51  ;;  %v283_v63 = vsel %vm281_vm3, %v276_v61, 0  ;;  %v933_v52 = vld [vmem:[%s1681_s7] ss:$0 sm:$0xff] }
   0x8   :  { %v73_v0 = vld [vmem:[%s1691_s23 + $0x80] sm:$0xff]  ;;  %v74_v1 = vld [vmem:[%s1691_s23 + $0x88] sm:$0xff]  ;;  %v75_v5 = vld [vmem:[%s1691_s23 + $0x90] sm:$0xff] }
   0x9   :  { %v57_v2 = vld [vmem:[%s1691_s23] sm:$0xff]  ;;  %v1182_v3 = vpack.c.bf16 %v74_v1, %v73_v0  ;;  %v58_v4 = vld [vmem:[%s1691_s23 + $0x8] sm:$0xff]  ;;  %v76_v6 = vld [vmem:[%s1691_s23 + $0x98] sm:$0xff] }
   0xa   :  { %v1184_v7 = vpack.c.bf16 %v58_v4, %v57_v2  ;;  %v1186_v8 = vpack.c.bf16 %v76_v6, %v75_v5  ;;  %v59_v9 = vld [vmem:[%s1691_s23 + $0x10] sm:$0xff]  ;;  %v60_v10 = vld [vmem:[%s1691_s23 + $0x18] sm:$0xff]  ;;  %v77_v11 = vld [vmem:[%s1691_s23 + $0xa0] sm:$0xff] }
   0xb   :  { %1183 = vmatprep.subr.bf16.mxu0 %v1182_v3  ;;  %v78_v12 = vld [vmem:[%s1691_s23 + $0xa8] sm:$0xff]  ;;  %v1188_v13 = vpack.c.bf16 %v60_v10, %v59_v9  ;;  %v61_v15 = vld [vmem:[%s1691_s23 + $0x20] sm:$0xff]  ;;  %v79_v17 = vld [vmem:[%s1691_s23 + $0xb0] sm:$0xff] }
   0xc   :  { %1185 = vmatpush3.bf16.msra.mxu0 %v1184_v7  ;;  %v1190_v14 = vpack.c.bf16 %v78_v12, %v77_v11  ;;  %v62_v16 = vld [vmem:[%s1691_s23 + $0x28] sm:$0xff]  ;;  %v80_v18 = vld [vmem:[%s1691_s23 + $0xb8] sm:$0xff]  ;;  %v63_v21 = vld [vmem:[%s1691_s23 + $0x30] sm:$0xff] }
   0xd   :  { %1187 = vmatprep.subr.bf16.mxu0 %v1186_v8  ;;  %v1192_v19 = vpack.c.bf16 %v62_v16, %v61_v15  ;;  %v1194_v20 = vpack.c.bf16 %v80_v18, %v79_v17  ;;  %v64_v22 = vld [vmem:[%s1691_s23 + $0x38] sm:$0xff]  ;;  %v81_v23 = vld [vmem:[%s1691_s23 + $0xc0] sm:$0xff]  ;;  %v82_v24 = vld [vmem:[%s1691_s23 + $0xc8] sm:$0xff] }
   0xe   :  { %v1196_v27 = vpack.c.bf16 %v64_v22, %v63_v21  ;;  %v1198_v28 = vpack.c.bf16 %v82_v24, %v81_v23  ;;  %v65_v29 = vld [vmem:[%s1691_s23 + $0x40] sm:$0xff]  ;;  %v66_v30 = vld [vmem:[%s1691_s23 + $0x48] sm:$0xff]  ;;  %v83_v31 = vld [vmem:[%s1691_s23 + $0xd0] sm:$0xff] }
   0xf   :  { %v84_v32 = vld [vmem:[%s1691_s23 + $0xd8] sm:$0xff]  ;;  %v1200_v33 = vpack.c.bf16 %v66_v30, %v65_v29  ;;  %v67_v35 = vld [vmem:[%s1691_s23 + $0x50] sm:$0xff]  ;;  %v85_v37 = vld [vmem:[%s1691_s23 + $0xe0] sm:$0xff] }
  0x10   :  { %1189 = vmatpush3.bf16.msra.mxu0 %v1188_v13  ;;  %v1202_v34 = vpack.c.bf16 %v84_v32, %v83_v31  ;;  %v68_v36 = vld [vmem:[%s1691_s23 + $0x58] sm:$0xff]  ;;  %v86_v38 = vld [vmem:[%s1691_s23 + $0xe8] sm:$0xff]  ;;  %v69_v41 = vld [vmem:[%s1691_s23 + $0x60] sm:$0xff] }
  0x11   :  { %1191 = vmatprep.subr.bf16.mxu0 %v1190_v14  ;;  %v1204_v39 = vpack.c.bf16 %v68_v36, %v67_v35  ;;  %v1206_v40 = vpack.c.bf16 %v86_v38, %v85_v37  ;;  %v70_v42 = vld [vmem:[%s1691_s23 + $0x68] sm:$0xff]  ;;  %v87_v43 = vld [vmem:[%s1691_s23 + $0xf0] sm:$0xff]  ;;  %v88_v44 = vld [vmem:[%s1691_s23 + $0xf8] sm:$0xff] }
  0x12   :  { %v1208_v45 = vpack.c.bf16 %v70_v42, %v69_v41  ;;  %v1210_v46 = vpack.c.bf16 %v88_v44, %v87_v43  ;;  %v71_v47 = vld [vmem:[%s1691_s23 + $0x70] sm:$0xff]  ;;  %v72_v48 = vld [vmem:[%s1691_s23 + $0x78] sm:$0xff]  ;;  %v1218_v4 = vld [vmem:[%s1677_s6] sm:$0xff]  }
  0x13   :  { %v1212_v49 = vpack.c.bf16 %v72_v48, %v71_v47  ;;  %v1220_v21 = vld [vmem:[%s1677_s6 + $0x10] sm:$0xff]   ;;  %v1221_v22 = vld [vmem:[%s1677_s6 + $0x18] sm:$0xff]   ;;  %v1222_v23 = vld [vmem:[%s1677_s6 + $0x20] sm:$0xff]  }
  0x14   :  { %1193 = vmatpush3.bf16.msra.mxu0 %v1192_v19  ;;  %v1223_v24 = vld [vmem:[%s1677_s6 + $0x28] sm:$0xff]   ;;  %v932_v32 = vld [vmem:[%s1679_s5] ss:$0 sm:$0xff]  ;;  %v1228_v43 = vld [vmem:[%s1678_s8 + $0x10] sm:$0xff]  }
  0x15   :  { %1195 = vmatprep.subr.bf16.mxu0 %v1194_v20  ;;  %v1219_v20 = vld [vmem:[%s1677_s6 + $0x8] sm:$0xff]   ;;  %v1229_v44 = vld [vmem:[%s1678_s8 + $0x18] sm:$0xff]   ;;  %v1232_v47 = vld [vmem:[%s1678_s8 + $0x30] sm:$0xff]  }
  0x16   :  { %v1233_v48 = vld [vmem:[%s1678_s8 + $0x38] sm:$0xff]  }
  0x18   :  { %1197 = vmatpush3.bf16.msra.mxu0 %v1196_v27  ;;  %v1226_v27 = vld [vmem:[%s1678_s8] sm:$0xff]  }
  0x19   :  { %1199 = vmatprep.subr.bf16.mxu0 %v1198_v28  ;;  %v1227_v28 = vld [vmem:[%s1678_s8 + $0x8] sm:$0xff]  }
  0x1c   :  { %1201 = vmatpush3.bf16.msra.mxu0 %v1200_v33 }
  0x1d   :  { %1203 = vmatprep.subr.bf16.mxu0 %v1202_v34 }
  0x20   :  { %1205 = vmatpush3.bf16.msra.mxu0 %v1204_v39 }
  0x21   :  { %1207 = vmatprep.subr.bf16.mxu0 %v1206_v40 }
  0x24   :  { %1209 = vmatpush3.bf16.msra.mxu0 %v1208_v45  ;;  %v1230_v45 = vld [vmem:[%s1678_s8 + $0x20] sm:$0xff]  }
  0x25   :  { %1211 = vmatprep.subr.bf16.mxu0 %v1210_v46  ;;  %v1231_v46 = vld [vmem:[%s1678_s8 + $0x28] sm:$0xff]  }
  0x28   :  { %1213 = vmatpush3.bf16.msra.mxu0 %v1212_v49  ;;  %v1234_v49 = vld [vmem:[%s1680_s10] sm:$0xff]  }
  0x29   :  { %1064 = vmatprep.subr.bf16.mxu0 %v1270_v51 }
  0x2b   :  { %154 = vmatmul.mubr.f32.vlgmr.msra.gmra.mrb[0].mxu0 %v54_v25  ;;  %v1224_v25 = vld [vmem:[%s1677_s6 + $0x30] sm:$0xff]  }
  0x2c   :  { %1066 = vmatprep.mubr.msk.bf16.mxu0 %vm1271_vm1, %v1270_v51  ;;  %1065 = vmatpush3.bf16.msra.mxu0 %v187_v54 }
  0x2d   :  { %1102 = vmatprep.subr.bf16.mxu0 %v1270_v51 }
  0xfe   :  { %v1010_v55 = vpop.f32.mrb[0].mxu0 }
  0xff   :  { %v1011_v56 = vpop.f32.mrb[1].mxu0 }
 0x100   :  { %v1012_v57 = vadd.f32 %v1011_v56, %v1010_v55 }
 0x102   :  { %v174_v58 = vpack.c.bf16 %v1012_v57, %v1012_v57  ;;  %v159_v59 = vmul.f32 %v1012_v57, %v1012_v57 }
 0x104   :  { %1073 = vmatmul.mubr.msk.bf16.vlgmr.msra.gmra.mrb[0].mxu1 %vm181_vm2, %v174_v58  ;;  %161 = vrot.lane.b32.xlu0 %v159_v59, %s1272_s2 }
 0x105   :  { %1078 = vmatprep.mubr.msk.bf16.mxu1 %vm1271_vm1, %v1270_v51  ;;  %1077 = vmatpush3.bf16.msra.mxu1 %v283_v63 }
 0x106   :  { %1082 = vmatprep.subr.bf16.mxu1 %v1270_v51 }
 0x10c   :  { %1079 = vmatmul.mubr.msk.bf16.vlgmr.msra.gmra.mrb[4].mxu1 %vm277_vm4, %v275_v62 }
 0x10d   :  { %1098 = vmatprep.mubr.msk.bf16.mxu1 %vm1271_vm1, %v1270_v51  ;;  %1083 = vmatpush3.bf16.msra.mxu1 %v1218_v4  ;;  %v1239_v4 = vld [vmem:[%s1680_s10 + $0x28] sm:$0xff]  }
 0x10e   :  { %1084 = vmatprep.subr.bf16.mxu1 %v1270_v51 }
 0x111   :  { %1085 = vmatpush3.bf16.msra.mxu1 %v1219_v20 }
 0x112   :  { %1086 = vmatprep.subr.bf16.mxu1 %v1270_v51 }
 0x115   :  { %1087 = vmatpush3.bf16.msra.mxu1 %v1220_v21 }
 0x116   :  { %1088 = vmatprep.subr.bf16.mxu1 %v1270_v51 }
 0x119   :  { %1089 = vmatpush3.bf16.msra.mxu1 %v1221_v22  ;;  %v1244_v22 = vld [vmem:[%s1682_s12 + $0x10] sm:$0xff]  }
 0x11a   :  { %1090 = vmatprep.subr.bf16.mxu1 %v1270_v51 }
 0x11d   :  { %1091 = vmatpush3.bf16.msra.mxu1 %v1222_v23  ;;  %v1245_v23 = vld [vmem:[%s1682_s12 + $0x18] sm:$0xff]  }
 0x11e   :  { %1092 = vmatprep.subr.bf16.mxu1 %v1270_v51 }
 0x121   :  { %1093 = vmatpush3.bf16.msra.mxu1 %v1223_v24  ;;  %v1246_v24 = vld [vmem:[%s1682_s12 + $0x20] sm:$0xff]  }
 0x122   :  { %1094 = vmatprep.subr.bf16.mxu1 %v1270_v51 }
 0x125   :  { %1095 = vmatpush3.bf16.msra.mxu1 %v1224_v25  ;;  %v1247_v25 = vld [vmem:[%s1682_s12 + $0x28] sm:$0xff]  }
 0x126   :  { %1096 = vmatprep.subr.bf16.mxu1 %v1270_v51 }
 0x129   :  { %1097 = vmatpush3.bf16.msra.mxu1 %v1225_v26  ;;  %v1248_v26 = vld [vmem:[%s1682_s12 + $0x30] sm:$0xff]  }
 0x12a   :  { %1122 = vmatprep.subr.bf16.mxu1 %v1270_v51 }
 0x176   :  { %v162_v0 = vpop.permute.xlu0 %161 }
 0x177   :  { %v164_v1 = vsub.f32 %v1012_v57, %v162_v0 }
 0x179   :  { %v165_v2 = vmul.f32 1.0666667, %v164_v1  ;;  %v1236_v1 = vld [vmem:[%s1680_s10 + $0x10] sm:$0xff]  }
 0x17b   :  { %v166_v3 = vmax.f32 %v165_v2, 0.0  ;;  %v1237_v2 = vld [vmem:[%s1680_s10 + $0x18] sm:$0xff]  }
 0x17d   :  { %1258 = vrsqrt.f32 %v166_v3  ;;  %vm169_vm5 = vcmp.eq.f32.partialorder %v166_v3, inf  ;;  %v172_v7 = vand.u32 2147483648, %v166_v3  ;;  %vm171_vm6 = vcmp.eq.f32.partialorder %v166_v3, 0.0 }
 0x187   :  { %v1259_v5 = vpop.eup %1258 }
 0x188   :  { %v168_v6 = vmul.f32 %v1259_v5, %v166_v3  ;;  %v1240_v5 = vld [vmem:[%s1680_s10 + $0x30] sm:$0xff]  }
 0x18a   :  { %v170_v8 = vsel %vm169_vm5, %v166_v3, %v168_v6  ;;  %v1238_v3 = vld [vmem:[%s1680_s10 + $0x20] sm:$0xff]   ;;  %v1241_v6 = vld [vmem:[%s1680_s10 + $0x38] sm:$0xff]  }
 0x18b   :  { %v173_v9 = vsel %vm171_vm6, %v172_v7, %v170_v8  ;;  %v1242_v7 = vld [vmem:[%s1682_s12] sm:$0xff]   ;;  %v1243_v8 = vld [vmem:[%s1682_s12 + $0x8] sm:$0xff]  }
 0x18c   :  { %v176_v10 = vpack.c.bf16 %v173_v9, %v173_v9  ;;  %v942_v9 = vld [vmem:[%s1683_s9] ss:$0 sm:$0xff] }
 0x18e   :  { %179 = vrot.lane.b32.xlu0 %v176_v10, %s1273_s4 }
 0x1d7   :  { %v269_v11 = vpop.f32.mrb[0].mxu1 }
 0x1d8   :  { %v1074_v12 = vpop.f32.mrb[1].mxu1 }
 0x1d9   :  { %v272_v13 = vpop.f32.mrb[2].mxu1 }
 0x1da   :  { %v1075_v14 = vpop.f32.mrb[3].mxu1 }
 0x1df   :  { %v319_v16 = vpop.f32.mrb[4].mxu1 }
 0x1e0   :  { %v1080_v17 = vpop.f32.mrb[5].mxu1 }
 0x1e1   :  { %v322_v18 = vpop.f32.mrb[6].mxu1 }
 0x1e2   :  { %v1081_v19 = vpop.f32.mrb[7].mxu1 }
 0x200   :  { %v180_v15 = vpop.permute.xlu0 %179 }
 0x201   :  { %1067 = vmatmul.mubr.msk.bf16.vlgmr.msra.gmra.mrb[4].mxu0 %vm181_vm2, %v180_v15 }
 0x202   :  { %1118 = vmatprep.mubr.msk.bf16.mxu0 %vm1271_vm1, %v1270_v51  ;;  %1103 = vmatpush3.bf16.msra.mxu0 %v1226_v27  ;;  %v1249_v27 = vld [vmem:[%s1682_s12 + $0x38] sm:$0xff]  }
 0x203   :  { %1104 = vmatprep.subr.bf16.mxu0 %v1270_v51 }
 0x206   :  { %1105 = vmatpush3.bf16.msra.mxu0 %v1227_v28  ;;  %v1250_v28 = vld [vmem:[%s1684_s14] sm:$0xff]  }
 0x207   :  { %1106 = vmatprep.subr.bf16.mxu0 %v1270_v51 }
 0x20a   :  { %1107 = vmatpush3.bf16.msra.mxu0 %v1228_v43  ;;  %v1252_v43 = vld [vmem:[%s1684_s14 + $0x10] sm:$0xff]  }
 0x20b   :  { %1108 = vmatprep.subr.bf16.mxu0 %v1270_v51 }
 0x20e   :  { %1109 = vmatpush3.bf16.msra.mxu0 %v1229_v44  ;;  %v1253_v44 = vld [vmem:[%s1684_s14 + $0x18] sm:$0xff]  }
 0x20f   :  { %1110 = vmatprep.subr.bf16.mxu0 %v1270_v51 }
 0x212   :  { %1111 = vmatpush3.bf16.msra.mxu0 %v1230_v45  ;;  %v1254_v45 = vld [vmem:[%s1684_s14 + $0x20] sm:$0xff]  }
 0x213   :  { %1112 = vmatprep.subr.bf16.mxu0 %v1270_v51 }
 0x216   :  { %1113 = vmatpush3.bf16.msra.mxu0 %v1231_v46  ;;  %v1255_v46 = vld [vmem:[%s1684_s14 + $0x28] sm:$0xff]  }
 0x217   :  { %1114 = vmatprep.subr.bf16.mxu0 %v1270_v51 }
 0x21a   :  { %1115 = vmatpush3.bf16.msra.mxu0 %v1232_v47  ;;  %v1256_v47 = vld [vmem:[%s1684_s14 + $0x30] sm:$0xff]  }
 0x21b   :  { %1116 = vmatprep.subr.bf16.mxu0 %v1270_v51 }
 0x21e   :  { %1117 = vmatpush3.bf16.msra.mxu0 %v1233_v48  ;;  %v1257_v48 = vld [vmem:[%s1684_s14 + $0x38] sm:$0xff]  }
 0x21f   :  { %1142 = vmatprep.subr.bf16.mxu0 %v1270_v51 }
 0x2d4   :  { %v223_v29 = vpop.f32.mrb[4].mxu0 }
 0x2d5   :  { %v270_v30 = vadd.f32 %v269_v11, %v223_v29  ;;  %v1068_v31 = vpop.f32.mrb[5].mxu0  ;;  %v1251_v29 = vld [vmem:[%s1684_s14 + $0x8] sm:$0xff]  }
 0x2d6   :  { %v226_v33 = vpop.f32.mrb[6].mxu0 }
 0x2d7   :  { %v325_v34 = vadd.f32 %v319_v16, %v270_v30  ;;  %v1069_v35 = vpop.f32.mrb[7].mxu0  ;;  %v951_v30 = vld [vmem:[%s1685_s11] ss:$0 sm:$0xff] }
 0x2d9   :  { %v333_v36 = vadd.f32 %v932_v32, %v325_v34 }
 0x2db   :  { %v334_v37 = vmul.f32 0.5, %v333_v36 }
 0x2dd   :  { %1260 = vtanh.f32 %v334_v37 }
 0x2e7   :  { %v1261_v38 = vpop.eup %1260 }
 0x2e8   :  { %v336_v39 = vadd.f32 1.0, %v1261_v38 }
 0x2ea   :  { %v337_v40 = vmul.f32 0.5, %v336_v39 }
 0x2ec   :  { %v338_v41 = vmul.f32 %v337_v40, %v333_v36 }
 0x2ee   :  { %v339_v42 = vpack.c.bf16 %v338_v41, %v338_v41 }
 0x2f0   :  { %1099 = vmatmul.mubr.bf16.vlgmr.msra.gmra.mrb[8].mxu1 %v339_v42 }
 0x2f1   :  { %1138 = vmatprep.mubr.msk.bf16.mxu1 %vm1271_vm1, %v1270_v51  ;;  %1123 = vmatpush3.bf16.msra.mxu1 %v1234_v49  ;;  %v960_v49 = vld [vmem:[%s1686_s13] ss:$0 sm:$0xff] }
 0x2f2   :  { %1124 = vmatprep.subr.bf16.mxu1 %v1270_v51 }
 0x2f5   :  { %1125 = vmatpush3.bf16.msra.mxu1 %v1235_v50 }
 0x2f6   :  { %1126 = vmatprep.subr.bf16.mxu1 %v1270_v51 }
 0x2f9   :  { %1127 = vmatpush3.bf16.msra.mxu1 %v1236_v1 }
 0x2fa   :  { %1128 = vmatprep.subr.bf16.mxu1 %v1270_v51 }
 0x2fd   :  { %1129 = vmatpush3.bf16.msra.mxu1 %v1237_v2 }
 0x2fe   :  { %1130 = vmatprep.subr.bf16.mxu1 %v1270_v51 }
 0x301   :  { %1131 = vmatpush3.bf16.msra.mxu1 %v1238_v3 }
 0x302   :  { %1132 = vmatprep.subr.bf16.mxu1 %v1270_v51 }
 0x305   :  { %1133 = vmatpush3.bf16.msra.mxu1 %v1239_v4 }
 0x306   :  { %1134 = vmatprep.subr.bf16.mxu1 %v1270_v51 }
 0x309   :  { %1135 = vmatpush3.bf16.msra.mxu1 %v1240_v5 }
 0x30a   :  { %1136 = vmatprep.subr.bf16.mxu1 %v1270_v51 }
 0x30d   :  { %1137 = vmatpush3.bf16.msra.mxu1 %v1241_v6 }
 0x30e   :  { %1162 = vmatprep.subr.bf16.mxu1 %v1270_v51 }
 0x3c3   :  { %v445_v53 = vpop.f32.mrb[8].mxu1 }
 0x3c4   :  { %v446_v54 = vadd.f32 %v933_v52, %v445_v53  ;;  %v1100_v55 = vpop.f32.mrb[9].mxu1 }
 0x3c5   :  { %v448_v56 = vpop.f32.mrb[10].mxu1 }
 0x3c6   :  { %v451_v57 = vmul.f32 0.5, %v446_v54  ;;  %v1101_v58 = vpop.f32.mrb[11].mxu1 }
 0x3c8   :  { %1262 = vtanh.f32 %v451_v57 }
 0x3d2   :  { %v1263_v59 = vpop.eup %1262 }
 0x3d3   :  { %v453_v60 = vadd.f32 1.0, %v1263_v59 }
 0x3d5   :  { %v454_v61 = vmul.f32 0.5, %v453_v60 }
 0x3d7   :  { %v455_v62 = vmul.f32 %v454_v61, %v446_v54 }
 0x3d9   :  { %v456_v63 = vadd.f32 %v455_v62, %v338_v41  ;;  %v969_v62 = vld [vmem:[%s1687_s15] ss:$0 sm:$0xff] }
 0x3db   :  { %v457_v0 = vpack.c.bf16 %v456_v63, %v456_v63 }
 0x3dd   :  { %1119 = vmatmul.mubr.bf16.vlgmr.msra.gmra.mrb[8].mxu0 %v457_v0 }
 0x3de   :  { %1158 = vmatprep.mubr.msk.bf16.mxu0 %vm1271_vm1, %v1270_v51  ;;  %1143 = vmatpush3.bf16.msra.mxu0 %v1242_v7 }
 0x3df   :  { %1144 = vmatprep.subr.bf16.mxu0 %v1270_v51 }
 0x3e2   :  { %1145 = vmatpush3.bf16.msra.mxu0 %v1243_v8 }
 0x3e3   :  { %1146 = vmatprep.subr.bf16.mxu0 %v1270_v51 }
 0x3e6   :  { %1147 = vmatpush3.bf16.msra.mxu0 %v1244_v22 }
 0x3e7   :  { %1148 = vmatprep.subr.bf16.mxu0 %v1270_v51 }
 0x3ea   :  { %1149 = vmatpush3.bf16.msra.mxu0 %v1245_v23 }
 0x3eb   :  { %1150 = vmatprep.subr.bf16.mxu0 %v1270_v51 }
 0x3ee   :  { %1151 = vmatpush3.bf16.msra.mxu0 %v1246_v24 }
 0x3ef   :  { %1152 = vmatprep.subr.bf16.mxu0 %v1270_v51 }
 0x3f2   :  { %1153 = vmatpush3.bf16.msra.mxu0 %v1247_v25 }
 0x3f3   :  { %1154 = vmatprep.subr.bf16.mxu0 %v1270_v51 }
 0x3f6   :  { %1155 = vmatpush3.bf16.msra.mxu0 %v1248_v26 }
 0x3f7   :  { %1156 = vmatprep.subr.bf16.mxu0 %v1270_v51 }
 0x3fa   :  { %1157 = vmatpush3.bf16.msra.mxu0 %v1249_v27 }
 0x4b0   :  { %v563_v10 = vpop.f32.mrb[8].mxu0 }
 0x4b1   :  { %v564_v11 = vadd.f32 %v942_v9, %v563_v10  ;;  %v1120_v12 = vpop.f32.mrb[9].mxu0 }
 0x4b2   :  { %v566_v13 = vpop.f32.mrb[10].mxu0 }
 0x4b3   :  { %v569_v14 = vmul.f32 0.5, %v564_v11  ;;  %v1121_v15 = vpop.f32.mrb[11].mxu0 }
 0x4b5   :  { %1264 = vtanh.f32 %v569_v14 }
 0x4bf   :  { %v1265_v16 = vpop.eup %1264 }
 0x4c0   :  { %v571_v17 = vadd.f32 1.0, %v1265_v16 }
 0x4c2   :  { %v572_v18 = vmul.f32 0.5, %v571_v17 }
 0x4c4   :  { %v573_v19 = vmul.f32 %v572_v18, %v564_v11 }
 0x4c6   :  { %v574_v20 = vadd.f32 %v573_v19, %v456_v63 }
 0x4c8   :  { %v575_v21 = vpack.c.bf16 %v574_v20, %v574_v20 }
 0x4ca   :  { %1139 = vmatmul.mubr.bf16.vlgmr.msra.gmra.mrb[12].mxu1 %v575_v21 }
 0x4cb   :  { %1178 = vmatprep.mubr.msk.bf16.mxu1 %vm1271_vm1, %v1270_v51  ;;  %1163 = vmatpush3.bf16.msra.mxu1 %v1250_v28 }
 0x4cc   :  { %1164 = vmatprep.subr.bf16.mxu1 %v1270_v51 }
 0x4cf   :  { %1165 = vmatpush3.bf16.msra.mxu1 %v1251_v29 }
 0x4d0   :  { %1166 = vmatprep.subr.bf16.mxu1 %v1270_v51 }
 0x4d3   :  { %1167 = vmatpush3.bf16.msra.mxu1 %v1252_v43 }
 0x4d4   :  { %1168 = vmatprep.subr.bf16.mxu1 %v1270_v51 }
 0x4d7   :  { %1169 = vmatpush3.bf16.msra.mxu1 %v1253_v44 }
 0x4d8   :  { %1170 = vmatprep.subr.bf16.mxu1 %v1270_v51 }
 0x4db   :  { %1171 = vmatpush3.bf16.msra.mxu1 %v1254_v45 }
 0x4dc   :  { %1172 = vmatprep.subr.bf16.mxu1 %v1270_v51 }
 0x4df   :  { %1173 = vmatpush3.bf16.msra.mxu1 %v1255_v46 }
 0x4e0   :  { %1174 = vmatprep.subr.bf16.mxu1 %v1270_v51 }
 0x4e3   :  { %1175 = vmatpush3.bf16.msra.mxu1 %v1256_v47 }
 0x4e4   :  { %1176 = vmatprep.subr.bf16.mxu1 %v1270_v51 }
 0x4e7   :  { %1177 = vmatpush3.bf16.msra.mxu1 %v1257_v48 }
 0x59d   :  { %v681_v31 = vpop.f32.mrb[12].mxu1 }
 0x59e   :  { %v682_v32 = vadd.f32 %v951_v30, %v681_v31  ;;  %v1140_v33 = vpop.f32.mrb[13].mxu1 }
 0x59f   :  { %v684_v34 = vpop.f32.mrb[14].mxu1 }
 0x5a0   :  { %v687_v35 = vmul.f32 0.5, %v682_v32  ;;  %v1141_v36 = vpop.f32.mrb[15].mxu1 }
 0x5a2   :  { %1266 = vtanh.f32 %v687_v35 }
 0x5ac   :  { %v1267_v37 = vpop.eup %1266 }
 0x5ad   :  { %v689_v38 = vadd.f32 1.0, %v1267_v37 }
 0x5af   :  { %v690_v39 = vmul.f32 0.5, %v689_v38 }
 0x5b1   :  { %v691_v40 = vmul.f32 %v690_v39, %v682_v32 }
 0x5b3   :  { %v692_v41 = vadd.f32 %v691_v40, %v574_v20 }
 0x5b5   :  { %v693_v42 = vpack.c.bf16 %v692_v41, %v692_v41 }
 0x5b7   :  { %1159 = vmatmul.mubr.bf16.vlgmr.msra.gmra.mrb[12].mxu0 %v693_v42 }
 0x68a   :  { %v799_v50 = vpop.f32.mrb[12].mxu0 }
 0x68b   :  { %v800_v52 = vadd.f32 %v960_v49, %v799_v50  ;;  %v1160_v53 = vpop.f32.mrb[13].mxu0 }
 0x68c   :  { %v802_v54 = vpop.f32.mrb[14].mxu0 }
 0x68d   :  { %v805_v55 = vmul.f32 0.5, %v800_v52  ;;  %v1161_v56 = vpop.f32.mrb[15].mxu0 }
 0x68f   :  { %1268 = vtanh.f32 %v805_v55 }
 0x699   :  { %v1269_v57 = vpop.eup %1268 }
 0x69a   :  { %v807_v58 = vadd.f32 1.0, %v1269_v57 }
 0x69c   :  { %v808_v59 = vmul.f32 0.5, %v807_v58 }
 0x69e   :  { %v809_v51 = vmul.f32 %v808_v59, %v800_v52 }
 0x6a0   :  { %v810_v60 = vadd.f32 %v809_v51, %v692_v41 }
 0x6a2   :  { %v811_v61 = vpack.c.bf16 %v810_v60, %v810_v60 }
 0x6a4   :  { %1179 = vmatmul.mubr.bf16.vlgmr.msra.gmra.mrb[16].mxu1 %v811_v61 }
 0x777   :  { %v917_v63 = vpop.f32.mrb[16].mxu1 }
 0x778   :  { %v918_v0 = vadd.f32 %v969_v62, %v917_v63  ;;  %v1180_v1 = vpop.f32.mrb[17].mxu1 }
 0x779   :  { %v920_v2 = vpop.f32.mrb[18].mxu1 }
 0x77a   :  { %v923_v3 = vpack.c.bf16 %v918_v0, %v918_v0  ;;  %v1181_v4 = vpop.f32.mrb[19].mxu1 }
 0x77c   :  { %924 = vst [vmem:[%s1688_s16] sm:$0xf] %v923_v3 }

</bundles_post_ra>
